<compile_context>
chip_gen: v7x
topology: tpu7x:2x2x1
jax: 0.10.0
libtpu: 0.0.40
codegen_flags: <defaults>
</compile_context>

<pallas_src>
import functools

import jax
import jax.numpy as jnp
from jax import lax
from jax.experimental import pallas as pl
from jax.experimental.pallas import tpu as pltpu


# --------------------------- fused attention kernel ---------------------------
def _fused_attn_kernel(q_ref, x_ref, wk_ref, bk_ref, mask_ref, o_ref, *,
                       num_heads, n_tokens, batch_block, mxu_dtype):
    """One grid step processes `batch_block` batch elements entirely in VMEM.

    Blocks:
      q_ref    (K, C)      pre-scaled query projection (batch invariant)
      x_ref    (bs*N, C)   tokens for this step's batch elements
      wk_ref   (C, C)      k-projection weight, PyTorch (out, in) layout
      bk_ref   (1, C)      k-projection bias
      mask_ref (H*N, C)    head block mask: mask[h*N + n, c] = (c // hd == h)
      o_ref    (bs*K, C)   output slab
    """
    H, N, bs = num_heads, n_tokens, batch_block
    Kq = q_ref.shape[0]

    cast = (lambda a: a.astype(mxu_dtype)) if mxu_dtype is not None else (lambda a: a)
    dn_nt = (((1,), (1,)), ((), ()))  # y = a @ b.T  (contract the input-channel dim)

    xb = x_ref[...]                                           # (bs*N, C)
    # k projection for every token of every batch element of this step: ONE matmul.
    k_all = lax.dot_general(cast(xb), cast(wk_ref[...]), dn_nt,
                            preferred_element_type=jnp.float32) + bk_ref[...]
    v_all = xb.astype(jnp.float32)

    mask_f = mask_ref[...]                                    # f32 {0, 1}
    qc = cast(q_ref[...])                                     # scale already folded in
    mc = cast(mask_f)

    for b in range(bs):                                       # static unroll (bs is 1 or B)
        k_b = k_all[b * N:(b + 1) * N]                        # (N, C)
        v_b = v_all[b * N:(b + 1) * N]                        # (N, C)

        # Block-diagonal layout: head h occupies rows h*N:(h+1)*N and its own
        # hd-wide lane block, so per-head attention collapses to 3 wide
        # matmuls (scores, output, denominator) with no per-head slicing,
        # no lane concatenate and no relayouts.
        k_bd = jnp.concatenate([k_b] * H, axis=0) * mask_f    # (H*N, C)
        v_bd = jnp.concatenate([v_b] * H, axis=0) * mask_f    # (H*N, C)

        s = lax.dot_general(qc, cast(k_bd), dn_nt,
                            preferred_element_type=jnp.float32)           # (K, H*N)
        # The global row-max is >= every per-head max and constant within a
        # row, so it is a valid (and cheaper) stabilizer for every segment.
        p = jnp.exp(s - jnp.max(s, axis=-1, keepdims=True))               # f32

        pc = cast(p)
        num = jnp.dot(pc, cast(v_bd), preferred_element_type=jnp.float32)  # (K, C)
        den = jnp.dot(pc, mc, preferred_element_type=jnp.float32)          # per-head sums, lane-aligned
        out_b = num * pl.reciprocal(den, approx=True)
        o_ref[b * Kq:(b + 1) * Kq, :] = out_b.astype(o_ref.dtype)


# --------------------------------- wrapper ------------------------------------
def _batch_block_default(batch):
    """v7x has 2 TensorCores/chip -> keep grid=(B,) 'parallel' so both get work;
    v5e/v6e have 1 TC (grid is a sequential loop) -> collapse to a single step."""
    try:
        kind = jax.devices()[0].device_kind.lower()
    except Exception:
        kind = ""
    multi_tc = ("v7" in kind) or ("7x" in kind)
    return 1 if multi_tc else batch


def attention_forward(x, query_embed, params, num_heads, *,
                      batch_block=None, mxu_dtype=None):
    """Matches Attention.forward: x (B,N,C), query_embed (1,K,C) -> (B,K,C).

    mxu_dtype: optionally cast matmul operands (e.g. jnp.bfloat16 on v6e/v7x);
    softmax / elementwise math always stays in f32 (v5e has no bf16 VPU/EUP).
    """
    B, N, C = x.shape
    K = query_embed.shape[1]
    H = num_heads
    hd = C // H
    scale = hd ** (-0.5)

    bs = _batch_block_default(B) if batch_block is None else batch_block
    assert B % bs == 0, (B, bs)

    # Hoisted, batch-invariant q projection with the softmax scale folded in.
    q = ((query_embed[0] @ params["wq"].T + params["bq"]) * scale).astype(jnp.float32)

    # Constant head-block mask: mask[h*N + n, c] = (c // hd == h).
    row_head = jnp.arange(H * N, dtype=jnp.int32)[:, None] // N
    col_head = jnp.arange(C, dtype=jnp.int32)[None, :] // hd
    mask_f = (row_head == col_head).astype(jnp.float32)                  # (H*N, C)

    x_flat = x.reshape(B * N, C)
    bk = params["bk"].reshape(1, C)

    kernel = functools.partial(_fused_attn_kernel, num_heads=H, n_tokens=N,
                               batch_block=bs, mxu_dtype=mxu_dtype)

    out_flat = pl.pallas_call(
        kernel,
        out_shape=jax.ShapeDtypeStruct((B * K, C), x.dtype),
        grid=(B // bs,),
        in_specs=[
            pl.BlockSpec((K, C), lambda i: (0, 0)),         # q (constant block)
            pl.BlockSpec((bs * N, C), lambda i: (i, 0)),    # tokens for this step
            pl.BlockSpec((C, C), lambda i: (0, 0)),         # wk (constant block)
            pl.BlockSpec((1, C), lambda i: (0, 0)),         # bk (constant block)
            pl.BlockSpec((H * N, C), lambda i: (0, 0)),     # head mask (constant block)
        ],
        out_specs=pl.BlockSpec((bs * K, C), lambda i: (i, 0)),
        compiler_params=pltpu.CompilerParams(dimension_semantics=("parallel",)),
    )(q, x_flat, params["wk"], bk, mask_f)

    return out_flat.reshape(B, K, C)


# ----------------------------- pure-JAX reference ----------------------------
def attention_reference(x, query_embed, params, num_heads):
    B, N, C = x.shape
    K = query_embed.shape[1]
    hd = C // num_heads
    scale = hd ** (-0.5)

    q = query_embed[0] @ params["wq"].T + params["bq"]                 # (K, C)
    q = jnp.broadcast_to(q[None], (B, K, C))
    k = x @ params["wk"].T + params["bk"]                              # (B, N, C)

    q = q.reshape(B, K, num_heads, hd).transpose(0, 2, 1, 3)
    k = k.reshape(B, N, num_heads, hd).transpose(0, 2, 1, 3)
    v = x.reshape(B, N, num_heads, hd).transpose(0, 2, 1, 3)

    attn = jnp.einsum("bhkd,bhnd->bhkn", q, k) * scale
    attn = jax.nn.softmax(attn, axis=-1)
    out = jnp.einsum("bhkn,bhnd->bhkd", attn, v)
    return out.transpose(0, 2, 1, 3).reshape(B, K, C)


# ------------------------------------ main ------------------------------------
if __name__ == "__main__":
    B, N, K = 2, 16, 8
    num_heads = 6
    C = 48  # dim divisible by num_heads; head_dim = 8

    key = jax.random.PRNGKey(0)
    kx, kq, kwq, kbq, kwk, kbk = jax.random.split(key, 6)

    x = jax.random.normal(kx, (B, N, C), dtype=jnp.float32)
    query_embed = jax.random.normal(kq, (1, K, C), dtype=jnp.float32)

    # Deterministic parameter init (nn.Linear(dim, dim, bias=True) x2).
    params = {
        "wq": jax.random.normal(kwq, (C, C), dtype=jnp.float32) * 0.05,
        "bq": jax.random.normal(kbq, (C,), dtype=jnp.float32) * 0.05,
        "wk": jax.random.normal(kwk, (C, C), dtype=jnp.float32) * 0.05,
        "bk": jax.random.normal(kbk, (C,), dtype=jnp.float32) * 0.05,
    }

    ref = attention_reference(x, query_embed, params, num_heads)

    # Default path: device-appropriate grid (collapsed on v5e/v6e, (B,) on v7x).
    out = jax.block_until_ready(attention_forward(x, query_embed, params, num_heads))
    assert out.shape == (B, K, C), out.shape
    assert jnp.allclose(out, ref, atol=2e-3, rtol=2e-3), (
        float(jnp.max(jnp.abs(out - ref))))

    # Explicitly exercise both grid layouts regardless of the local chip.
    out_collapsed = jax.block_until_ready(
        attention_forward(x, query_embed, params, num_heads, batch_block=B))
    assert jnp.allclose(out_collapsed, ref, atol=2e-3, rtol=2e-3)

    out_per_batch = jax.block_until_ready(
        attention_forward(x, query_embed, params, num_heads, batch_block=1))
    assert jnp.allclose(out_per_batch, ref, atol=2e-3, rtol=2e-3)

    # bf16 MXU operands (v6e/v7x fast path); softmax / accumulation stay f32.
    out_bf16 = jax.block_until_ready(
        attention_forward(x, query_embed, params, num_heads, mxu_dtype=jnp.bfloat16))
    assert jnp.allclose(out_bf16, ref, atol=5e-2, rtol=5e-2)

    print("KERNEL_OK")
</pallas_src>

<mosaic_0001>
module attributes {stable_mosaic.version = 11 : i64} {
  func.func @_fused_attn_kernel(%arg0: i32, %arg1: memref<8x48xf32, #tpu.memory_space<vmem>>, %arg2: memref<32x48xf32, #tpu.memory_space<vmem>>, %arg3: memref<48x48xf32, #tpu.memory_space<vmem>>, %arg4: memref<1x48xf32, #tpu.memory_space<vmem>>, %arg5: memref<96x48xf32, #tpu.memory_space<vmem>>, %arg6: memref<16x48xf32, #tpu.memory_space<vmem>>) attributes {dimension_semantics = [#tpu.dimension_semantics<parallel>], iteration_bounds = array<i64: 1>, scalar_prefetch = 0 : i64, scratch_operands = 0 : i64, tpu.core_type = #tpu.core_type<tc>, window_params = [{pipeline_mode = #tpu.pipeline_mode<synchronous>, transform_indices = @transform_0, window_bounds = array<i64: 8, 48>}, {transform_indices = @transform_1, window_bounds = array<i64: 32, 48>}, {pipeline_mode = #tpu.pipeline_mode<synchronous>, transform_indices = @transform_2, window_bounds = array<i64: 48, 48>}, {pipeline_mode = #tpu.pipeline_mode<synchronous>, transform_indices = @transform_3, window_bounds = array<i64: 1, 48>}, {pipeline_mode = #tpu.pipeline_mode<synchronous>, transform_indices = @transform_4, window_bounds = array<i64: 96, 48>}, {transform_indices = @transform_5, window_bounds = array<i64: 16, 48>}]} {
    %c0 = arith.constant 0 : index
    %c0_0 = arith.constant 0 : index
    %0 = vector.load %arg2[%c0, %c0_0] : memref<32x48xf32, #tpu.memory_space<vmem>>, vector<32x48xf32>
    %c0_1 = arith.constant 0 : index
    %c0_2 = arith.constant 0 : index
    %1 = vector.load %arg3[%c0_1, %c0_2] : memref<48x48xf32, #tpu.memory_space<vmem>>, vector<48x48xf32>
    %cst = arith.constant dense<0.000000e+00> : vector<32x48xf32>
    %2 = tpu.matmul %0, %1, %cst {dimension_numbers = #tpu.dot_dimension_numbers<[1], [1], [0], [0], [0, 0, 1, 0], [], []>} : vector<32x48xf32>, vector<48x48xf32>, vector<32x48xf32> -> vector<32x48xf32>
    %c0_3 = arith.constant 0 : index
    %c0_4 = arith.constant 0 : index
    %3 = vector.load %arg4[%c0_3, %c0_4] : memref<1x48xf32, #tpu.memory_space<vmem>>, vector<1x48xf32>
    %4 = vector.broadcast %3 : vector<1x48xf32> to vector<32x48xf32>
    %5 = arith.addf %2, %4 : vector<32x48xf32>
    %c0_5 = arith.constant 0 : index
    %c0_6 = arith.constant 0 : index
    %6 = vector.load %arg5[%c0_5, %c0_6] : memref<96x48xf32, #tpu.memory_space<vmem>>, vector<96x48xf32>
    %c0_7 = arith.constant 0 : index
    %c0_8 = arith.constant 0 : index
    %7 = vector.load %arg1[%c0_7, %c0_8] : memref<8x48xf32, #tpu.memory_space<vmem>>, vector<8x48xf32>
    %8 = vector.extract_strided_slice %5 {offsets = [0, 0], sizes = [16, 48], strides = [1, 1]} : vector<32x48xf32> to vector<16x48xf32>
    %9 = vector.extract_strided_slice %0 {offsets = [0, 0], sizes = [16, 48], strides = [1, 1]} : vector<32x48xf32> to vector<16x48xf32>
    %10 = tpu.concatenate %8, %8, %8, %8, %8, %8 in 0 : vector<16x48xf32>, vector<16x48xf32>, vector<16x48xf32>, vector<16x48xf32>, vector<16x48xf32>, vector<16x48xf32> -> vector<96x48xf32>
    %11 = arith.mulf %10, %6 : vector<96x48xf32>
    %12 = tpu.concatenate %9, %9, %9, %9, %9, %9 in 0 : vector<16x48xf32>, vector<16x48xf32>, vector<16x48xf32>, vector<16x48xf32>, vector<16x48xf32>, vector<16x48xf32> -> vector<96x48xf32>
    %13 = arith.mulf %12, %6 : vector<96x48xf32>
    %cst_9 = arith.constant dense<0.000000e+00> : vector<8x96xf32>
    %14 = tpu.matmul %7, %11, %cst_9 {dimension_numbers = #tpu.dot_dimension_numbers<[1], [1], [0], [0], [0, 0, 1, 0], [], []>} : vector<8x48xf32>, vector<96x48xf32>, vector<8x96xf32> -> vector<8x96xf32>
    %cst_10 = arith.constant dense<0xFF800000> : vector<8xf32>
    %15 = vector.multi_reduction <maximumf>, %14, %cst_10 [1] : vector<8x96xf32> to vector<8xf32>
    %16 = vector.shape_cast %15 : vector<8xf32> to vector<8x1xf32>
    %17 = vector.broadcast %16 : vector<8x1xf32> to vector<8x96xf32>
    %18 = arith.subf %14, %17 : vector<8x96xf32>
    %19 = math.exp %18 : vector<8x96xf32>
    %cst_11 = arith.constant dense<0.000000e+00> : vector<8x48xf32>
    %20 = tpu.matmul %19, %13, %cst_11 {dimension_numbers = #tpu.dot_dimension_numbers<[1], [0], [0], [1], [0, 0, 1, 1], [], []>} : vector<8x96xf32>, vector<96x48xf32>, vector<8x48xf32> -> vector<8x48xf32>
    %cst_12 = arith.constant dense<0.000000e+00> : vector<8x48xf32>
    %21 = tpu.matmul %19, %6, %cst_12 {dimension_numbers = #tpu.dot_dimension_numbers<[1], [0], [0], [1], [0, 0, 1, 1], [], []>} : vector<8x96xf32>, vector<96x48xf32>, vector<8x48xf32> -> vector<8x48xf32>
    %22 = tpu.reciprocal %21 {approx = true} : vector<8x48xf32> -> vector<8x48xf32>
    %23 = arith.mulf %20, %22 : vector<8x48xf32>
    %c0_13 = arith.constant 0 : index
    %c0_14 = arith.constant 0 : index
    %24 = vector.load %arg6[%c0_13, %c0_14] : memref<16x48xf32, #tpu.memory_space<vmem>>, vector<8x48xf32>
    tpu.vector_store %arg6[%c0_13, %c0_14], %23 {strides = array<i32>} : memref<16x48xf32, #tpu.memory_space<vmem>>, vector<8x48xf32>,
    %25 = vector.extract_strided_slice %5 {offsets = [16, 0], sizes = [16, 48], strides = [1, 1]} : vector<32x48xf32> to vector<16x48xf32>
    %26 = vector.extract_strided_slice %0 {offsets = [16, 0], sizes = [16, 48], strides = [1, 1]} : vector<32x48xf32> to vector<16x48xf32>
    %27 = tpu.concatenate %25, %25, %25, %25, %25, %25 in 0 : vector<16x48xf32>, vector<16x48xf32>, vector<16x48xf32>, vector<16x48xf32>, vector<16x48xf32>, vector<16x48xf32> -> vector<96x48xf32>
    %28 = arith.mulf %27, %6 : vector<96x48xf32>
    %29 = tpu.concatenate %26, %26, %26, %26, %26, %26 in 0 : vector<16x48xf32>, vector<16x48xf32>, vector<16x48xf32>, vector<16x48xf32>, vector<16x48xf32>, vector<16x48xf32> -> vector<96x48xf32>
    %30 = arith.mulf %29, %6 : vector<96x48xf32>
    %cst_15 = arith.constant dense<0.000000e+00> : vector<8x96xf32>
    %31 = tpu.matmul %7, %28, %cst_15 {dimension_numbers = #tpu.dot_dimension_numbers<[1], [1], [0], [0], [0, 0, 1, 0], [], []>} : vector<8x48xf32>, vector<96x48xf32>, vector<8x96xf32> -> vector<8x96xf32>
    %cst_16 = arith.constant dense<0xFF800000> : vector<8xf32>
    %32 = vector.multi_reduction <maximumf>, %31, %cst_16 [1] : vector<8x96xf32> to vector<8xf32>
    %33 = vector.shape_cast %32 : vector<8xf32> to vector<8x1xf32>
    %34 = vector.broadcast %33 : vector<8x1xf32> to vector<8x96xf32>
    %35 = arith.subf %31, %34 : vector<8x96xf32>
    %36 = math.exp %35 : vector<8x96xf32>
    %cst_17 = arith.constant dense<0.000000e+00> : vector<8x48xf32>
    %37 = tpu.matmul %36, %30, %cst_17 {dimension_numbers = #tpu.dot_dimension_numbers<[1], [0], [0], [1], [0, 0, 1, 1], [], []>} : vector<8x96xf32>, vector<96x48xf32>, vector<8x48xf32> -> vector<8x48xf32>
    %cst_18 = arith.constant dense<0.000000e+00> : vector<8x48xf32>
    %38 = tpu.matmul %36, %6, %cst_18 {dimension_numbers = #tpu.dot_dimension_numbers<[1], [0], [0], [1], [0, 0, 1, 1], [], []>} : vector<8x96xf32>, vector<96x48xf32>, vector<8x48xf32> -> vector<8x48xf32>
    %39 = tpu.reciprocal %38 {approx = true} : vector<8x48xf32> -> vector<8x48xf32>
    %40 = arith.mulf %37, %39 : vector<8x48xf32>
    %c8 = arith.constant 8 : index
    %c0_19 = arith.constant 0 : index
    %41 = vector.load %arg6[%c8, %c0_19] : memref<16x48xf32, #tpu.memory_space<vmem>>, vector<8x48xf32>
    tpu.vector_store %arg6[%c8, %c0_19], %40 {strides = array<i32>} : memref<16x48xf32, #tpu.memory_space<vmem>>, vector<8x48xf32>,
    return
  }
  func.func @transform_0(%arg0: i32) -> (i32, i32) {
    %c0_i32 = arith.constant 0 : i32
    %c0_i32_0 = arith.constant 0 : i32
    %c0_i32_1 = arith.constant 0 : i32
    return %c0_i32, %c0_i32_0 : i32, i32
  }
  func.func @transform_1(%arg0: i32) -> (i32, i32) {
    %c0_i32 = arith.constant 0 : i32
    %c0_i32_0 = arith.constant 0 : i32
    return %arg0, %c0_i32 : i32, i32
  }
  func.func @transform_2(%arg0: i32) -> (i32, i32) {
    %c0_i32 = arith.constant 0 : i32
    %c0_i32_0 = arith.constant 0 : i32
    %c0_i32_1 = arith.constant 0 : i32
    return %c0_i32, %c0_i32_0 : i32, i32
  }
  func.func @transform_3(%arg0: i32) -> (i32, i32) {
    %c0_i32 = arith.constant 0 : i32
    %c0_i32_0 = arith.constant 0 : i32
    %c0_i32_1 = arith.constant 0 : i32
    return %c0_i32, %c0_i32_0 : i32, i32
  }
  func.func @transform_4(%arg0: i32) -> (i32, i32) {
    %c0_i32 = arith.constant 0 : i32
    %c0_i32_0 = arith.constant 0 : i32
    %c0_i32_1 = arith.constant 0 : i32
    return %c0_i32, %c0_i32_0 : i32, i32
  }
  func.func @transform_5(%arg0: i32) -> (i32, i32) {
    %c0_i32 = arith.constant 0 : i32
    %c0_i32_0 = arith.constant 0 : i32
    return %arg0, %c0_i32 : i32, i32
  }
}

</mosaic_0001>

<bundles_post_ra>
// kernel: tpu_custom_call.1
= control target key start
LH: loop header
LB: loop body
LE: loop exit
PB: predicated region body
PF: predicated region fallthrough
CT: control target
= control target key end

     0   :  { %vm38_vm0 = vcmask 392192   ;;  %s1580_s0 = inlined_call_operand.vmem [shape: f32[8,48], index: 0, kind: input, shape index: {}]   ;;  %s1581_s1 = inlined_call_operand.vmem [shape: f32[32,48], index: 1, kind: input, shape index: {}]   ;;  %s1582_s2 = inlined_call_operand.vmem [shape: f32[48,48], index: 2, kind: input, shape index: {}]   ;;  %s1583_s3 = inlined_call_operand.vmem [shape: f32[1,48], index: 3, kind: input, shape index: {}]   ;;  %s1584_s4 = inlined_call_operand.vmem [shape: f32[96,48], index: 4, kind: input, shape index: {}]   ;;  %s1585_s5 = inlined_call_operand.hbm [shape: f32[16,48], index: 5, kind: output, shape index: {}]  }
   0x1   :  { %v25_v0 = vld [vmem:[%s1582_s2] sm:$0xff]  ;;  %v26_v1 = vld [vmem:[%s1582_s2 + $0x8] sm:$0xff]  ;;  %v27_v2 = vld [vmem:[%s1582_s2 + $0x10] sm:$0xff] }
   0x2   :  { %v1060_v3 = vpack.c.bf16 %v26_v1, %v25_v0  ;;  %vm1283_vm1 = vmpackc.low %vm38_vm0, %vm38_vm0  ;;  %v28_v5 = vld [vmem:[%s1582_s2 + $0x18] sm:$0xff]  ;;  %v1293_v7 = vld [vmem:[%s1581_s1] sm:$0xff] }
   0x3   :  { %v1066_v6 = vpack.c.bf16 %v28_v5, %v27_v2  ;;  %892 = vmatprep.mubr.msk.f32.mxu0 %vm38_vm0, %v1293_v7 }
   0x4   :  { %1062 = vmatprep.subr.msk.bf16.mxu0 %vm1283_vm1, %v1060_v3 }
   0x5   :  { %10 = vsyncpa [#allocation3], 0  ;;  %1065 = vmatpush3.bf16.xpose.msk.msra.mxu0 %vm1283_vm1, %v1060_v3  ;;  %v29_v8 = vld [vmem:[%s1582_s2 + $0x20] sm:$0xff]  ;;  %v30_v9 = vld [vmem:[%s1582_s2 + $0x28] sm:$0xff]  ;;  %v1236_v14 = vmov 0.0|0.0   ;;  %vm1237_vm2 = vmmov 0  }
   0x6   :  { %1068 = vmatprep.subr.msk.bf16.mxu0 %vm1283_vm1, %v1066_v6  ;;  %v1072_v10 = vpack.c.bf16 %v30_v9, %v29_v8  ;;  %v1318_v11 = vld [vmem:[%s1581_s1 + $0x8] sm:$0xff]  ;;  %v1323_v12 = vld [vmem:[%s1581_s1 + $0x10] sm:$0xff]  ;;  %v1332_v13 = vld [vmem:[%s1581_s1 + $0x18] sm:$0xff]  ;;  %1078 = vmatprep.subr.bf16.mxu1 %v1236_v14  ;;  %v1238_v15 = vmov 0.0   ;;  %vm300_vm3 = vcmask 785408  }
   0x7   :  { %922 = vmatprep.mubr.msk.f32.mxu1 %vm1237_vm2, %v1238_v15  ;;  %v751_v16 = vld [vmem:[%s1583_s3] ss:$0 sm:$0xff]  ;;  %v1353_v18 = vld [vmem:[%s1584_s4 + $0x8] sm:$0xff]  ;;  %v1358_v20 = vld [vmem:[%s1584_s4 + $0x18] sm:$0xff] }
   0x8   :  { %v1348_v17 = vld [vmem:[%s1584_s4] sm:$0xff]  ;;  %v1363_v21 = vld [vmem:[%s1584_s4 + $0x28] sm:$0xff]  ;;  %v1368_v22 = vld [vmem:[%s1584_s4 + $0x38] sm:$0xff] }
   0x9   :  { %v1373_v25 = vld [vmem:[%s1584_s4 + $0x10] sm:$0xff]  ;;  %v1378_v26 = vld [vmem:[%s1584_s4 + $0x20] sm:$0xff]  ;;  %v1393_v30 = vld [vmem:[%s1584_s4 + $0x48] sm:$0xff] }
   0xa   :  { %v1383_v27 = vld [vmem:[%s1584_s4 + $0x30] sm:$0xff]  ;;  %v1388_v29 = vld [vmem:[%s1584_s4 + $0x40] sm:$0xff]  ;;  %v1411_v41 = vld [vmem:[%s1584_s4 + $0x58] sm:$0xff]  ;;  %v183_v4 = vmul.f32 %v1378_v26, %v1293_v7 }
   0xb   :  { %v1398_v31 = vld [vmem:[%s1584_s4 + $0x50] sm:$0xff] }
   0xd   :  { %1071 = vmatpush3.bf16.xpose.msk.msra.mxu0 %vm1283_vm1, %v1066_v6 }
   0xe   :  { %1074 = vmatprep.subr.msk.bf16.mxu0 %vm1283_vm1, %v1072_v10 }
  0x15   :  { %1077 = vmatpush3.bf16.xpose.msk.msra.mxu0 %vm1283_vm1, %v1072_v10 }
  0x16   :  { %1102 = vmatprep.subr.bf16.mxu0 %v1236_v14 }
  0x1c   :  { %893 = vmatmul.mubr.msk.f32.vlgmr.msra.gmra.mrb[0].mxu0 %vm38_vm0, %v1318_v11 }
  0x1d   :  { %895 = vmatprep.mubr.msk.f32.mxu0 %vm38_vm0, %v1323_v12 }
  0x20   :  { %896 = vmatmul.mubr.msk.f32.gmra.mrb[2].mxu0 %vm38_vm0, %v1332_v13 }
  0x21   :  { %949 = vmatprep.mubr.msk.f32.mxu0 %vm1237_vm2, %v1238_v15 }
  0xef   :  { %v894_v19 = vpop.f32.mrb[0].mxu0 }
  0xf0   :  { %v141_v23 = vadd.f32 %v894_v19, %v751_v16  ;;  %v135_v24 = vpop.f32.mrb[1].mxu0  ;;  %v179_v19 = vmul.f32 %v1348_v17, %v1293_v7 }
  0xf1   :  { %v136_v28 = vadd.f32 %v751_v16, %v135_v24  ;;  %v181_v24 = vmul.f32 %v1373_v25, %v1293_v7 }
  0xf2   :  { %v168_v32 = vmul.f32 %v1353_v18, %v141_v23  ;;  %v170_v33 = vmul.f32 %v1358_v20, %v141_v23  ;;  %v172_v34 = vmul.f32 %v1363_v21, %v141_v23  ;;  %v174_v35 = vmul.f32 %v1368_v22, %v141_v23 }
  0xf3   :  { %v167_v36 = vmul.f32 %v1348_v17, %v136_v28  ;;  %v169_v37 = vmul.f32 %v1373_v25, %v136_v28  ;;  %v171_v38 = vmul.f32 %v1378_v26, %v136_v28  ;;  %v173_v39 = vmul.f32 %v1383_v27, %v136_v28  ;;  %v897_v40 = vpop.f32.mrb[2].mxu0 }
  0xf4   :  { %v175_v42 = vmul.f32 %v1388_v29, %v136_v28  ;;  %v176_v43 = vmul.f32 %v1393_v30, %v141_v23  ;;  %v151_v44 = vadd.f32 %v897_v40, %v751_v16  ;;  %v145_v45 = vpop.f32.mrb[3].mxu0  ;;  %v177_v46 = vmul.f32 %v1398_v31, %v136_v28 }
  0xf5   :  { %v1079_v47 = vpack.c.bf16 %v168_v32, %v167_v36  ;;  %v1083_v48 = vpack.c.bf16 %v170_v33, %v169_v37  ;;  %v1087_v49 = vpack.c.bf16 %v172_v34, %v171_v38  ;;  %v1091_v50 = vpack.c.bf16 %v174_v35, %v173_v39 }
  0xf6   :  { %v1095_v51 = vpack.c.bf16 %v176_v43, %v175_v42  ;;  %v146_v52 = vadd.f32 %v751_v16, %v145_v45  ;;  %v178_v53 = vmul.f32 %v1411_v41, %v141_v23  ;;  %v454_v54 = vmul.f32 %v1353_v18, %v151_v44  ;;  %v166_v16 = vld [vmem:[%s1580_s0] sm:$0xff]  ;;  %s1239_s0 = smov [#allocation2]  }
  0xf7   :  { %1081 = vmatpush3.bf16.xpose.msk.msra.mxu1 %vm1283_vm1, %v1079_v47  ;;  %v456_v55 = vmul.f32 %v1358_v20, %v151_v44  ;;  %v458_v56 = vmul.f32 %v1363_v21, %v151_v44  ;;  %v460_v57 = vmul.f32 %v1368_v22, %v151_v44  ;;  %v462_v58 = vmul.f32 %v1393_v30, %v151_v44  ;;  %s740_s11 = sshll.u32 %s1239_s0, 4  ;;  %s741_s11 = int_to_ptr.vmem [resolvable:$true] %s740_s11 }
  0xf8   :  { %1082 = vmatprep.subr.bf16.mxu1 %v1236_v14  ;;  %v1099_v59 = vpack.c.bf16 %v178_v53, %v177_v46  ;;  %v453_v60 = vmul.f32 %v1348_v17, %v146_v52  ;;  %v455_v61 = vmul.f32 %v1373_v25, %v146_v52  ;;  %v457_v62 = vmul.f32 %v1378_v26, %v146_v52  ;;  %s1212_s12 = scalar_lea.vmem %s741_s11, 256  ;;  %p1217_p1 = scmp.lt.s32.totalorder %s741_s11, %s741_s11 }
  0xf9   :  { %v459_v63 = vmul.f32 %v1383_v27, %v146_v52  ;;  %v461_v0 = vmul.f32 %v1388_v29, %v146_v52  ;;  %v463_v1 = vmul.f32 %v1398_v31, %v146_v52  ;;  %v464_v2 = vmul.f32 %v1411_v41, %v151_v44  ;;  %p1213_p0 = scmp.ne.s32.totalorder %s741_s11, %s1212_s12  ;;  %p1218_p2 = scmp.lt.s32.totalorder %s1212_s12, %s1212_s12 }
  0xfa   :  { %v1139_v3 = vpack.c.bf16 %v454_v54, %v453_v60  ;;  %v1143_v5 = vpack.c.bf16 %v456_v55, %v455_v61  ;;  %v1147_v6 = vpack.c.bf16 %v458_v56, %v457_v62  ;;  %v180_v23 = vmul.f32 %v1353_v18, %v1318_v11 }
  0xfb   :  { %v1151_v8 = vpack.c.bf16 %v460_v57, %v459_v63  ;;  %v1155_v9 = vpack.c.bf16 %v462_v58, %v461_v0  ;;  %v1159_v10 = vpack.c.bf16 %v464_v2, %v463_v1  ;;  %v182_v28 = vmul.f32 %v1358_v20, %v1318_v11  ;;  %p1219_p3 = por %p1218_p2, %p1217_p1 }
  0xfc   :  { %v1103_v32 = vpack.c.bf16 %v180_v23, %v179_v19  ;;  %v184_v34 = vmul.f32 %v1363_v21, %v1318_v11  ;;  %v185_v39 = vmul.f32 %v1383_v27, %v1293_v7  ;;  %v186_v40 = vmul.f32 %v1368_v22, %v1318_v11 }
  0xfd   :  { %v1106_v33 = vpack.c.bf16 %v182_v28, %v181_v24  ;;  %v187_v42 = vmul.f32 %v1388_v29, %v1293_v7  ;;  %v188_v43 = vmul.f32 %v1393_v30, %v1318_v11  ;;  %v189_v46 = vmul.f32 %v1398_v31, %v1293_v7  ;;  %p1220_p4 = pnand %p1219_p3, %p1213_p0 }
  0xfe   :  { %1104 = vmatpush3.bf16.msra.mxu0 %v1103_v32  ;;  %v1109_v35 = vpack.c.bf16 %v184_v34, %v183_v4  ;;  %v1112_v44 = vpack.c.bf16 %v186_v40, %v185_v39  ;;  %v190_v47 = vmul.f32 %v1411_v41, %v1318_v11  ;;  %v1121_v11 = vpack.c.bf16 %v1353_v18, %v1348_v17 }
  0xff   :  { %1085 = vmatpush3.bf16.xpose.msk.msra.mxu1 %vm1283_vm1, %v1083_v48  ;;  %1105 = vmatprep.subr.bf16.mxu0 %v1236_v14  ;;  %v1115_v45 = vpack.c.bf16 %v188_v43, %v187_v42  ;;  %v1124_v55 = vpack.c.bf16 %v1358_v20, %v1373_v25  ;;  %v1127_v56 = vpack.c.bf16 %v1363_v21, %v1378_v26 }
 0x100   :  { %1086 = vmatprep.subr.bf16.mxu1 %v1236_v14  ;;  %v1118_v48 = vpack.c.bf16 %v190_v47, %v189_v46  ;;  %v1130_v57 = vpack.c.bf16 %v1368_v22, %v1383_v27  ;;  %v1133_v58 = vpack.c.bf16 %v1393_v30, %v1388_v29  ;;  %v465_v60 = vmul.f32 %v1348_v17, %v1323_v12 }
 0x101   :  { %v466_v61 = vmul.f32 %v1353_v18, %v1332_v13  ;;  %v467_v63 = vmul.f32 %v1373_v25, %v1323_v12  ;;  %v468_v0 = vmul.f32 %v1358_v20, %v1332_v13  ;;  %v469_v17 = vmul.f32 %v1378_v26, %v1323_v12 }
 0x102   :  { %1107 = vmatpush3.bf16.msra.mxu0 %v1106_v33  ;;  %v470_v18 = vmul.f32 %v1363_v21, %v1332_v13  ;;  %v471_v20 = vmul.f32 %v1383_v27, %v1323_v12  ;;  %v472_v2 = vmul.f32 %v1368_v22, %v1332_v13  ;;  %v473_v21 = vmul.f32 %v1388_v29, %v1323_v12 }
 0x103   :  { %1108 = vmatprep.subr.bf16.mxu0 %v1236_v14  ;;  %v1163_v62 = vpack.c.bf16 %v466_v61, %v465_v60  ;;  %v1166_v1 = vpack.c.bf16 %v468_v0, %v467_v63  ;;  %v475_v22 = vmul.f32 %v1398_v31, %v1323_v12 }
 0x104   :  { %v1169_v25 = vpack.c.bf16 %v470_v18, %v469_v17 }
 0x106   :  { %1110 = vmatpush3.bf16.msra.mxu0 %v1109_v35 }
 0x107   :  { %1089 = vmatpush3.bf16.xpose.msk.msra.mxu1 %vm1283_vm1, %v1087_v49  ;;  %1111 = vmatprep.subr.bf16.mxu0 %v1236_v14 }
 0x108   :  { %1090 = vmatprep.subr.bf16.mxu1 %v1236_v14 }
 0x10a   :  { %1113 = vmatpush3.bf16.msra.mxu0 %v1112_v44 }
 0x10b   :  { %1114 = vmatprep.subr.bf16.mxu0 %v1236_v14 }
 0x10e   :  { %1116 = vmatpush3.bf16.msra.mxu0 %v1115_v45 }
 0x10f   :  { %1093 = vmatpush3.bf16.xpose.msk.msra.mxu1 %vm1283_vm1, %v1091_v50  ;;  %1117 = vmatprep.subr.bf16.mxu0 %v1236_v14 }
 0x110   :  { %1094 = vmatprep.subr.bf16.mxu1 %v1236_v14 }
 0x112   :  { %1119 = vmatpush3.bf16.msra.mxu0 %v1118_v48 }
 0x113   :  { %1120 = vmatprep.subr.bf16.mxu0 %v1236_v14 }
 0x117   :  { %1097 = vmatpush3.bf16.xpose.msk.msra.mxu1 %vm1283_vm1, %v1095_v51 }
 0x118   :  { %1098 = vmatprep.subr.bf16.mxu1 %v1236_v14 }
 0x11f   :  { %1101 = vmatpush3.bf16.xpose.msk.msra.mxu1 %vm1283_vm1, %v1099_v59  ;;  %v1136_v59 = vpack.c.bf16 %v1411_v41, %v1398_v31 }
 0x120   :  { %1138 = vmatprep.subr.bf16.mxu1 %v1236_v14 }
 0x126   :  { %923 = vmatmul.mubr.msk.f32.vlgmr.msra.gmra.mrb[0].mxu1 %vm38_vm0, %v166_v16 }
 0x127   :  { %1141 = vmatpush3.bf16.xpose.msk.msra.mxu1 %vm1283_vm1, %v1139_v3  ;;  %1003 = vmatprep.mubr.msk.f32.mxu1 %vm1237_vm2, %v1238_v15 }
 0x128   :  { %1142 = vmatprep.subr.bf16.mxu1 %v1236_v14 }
 0x12f   :  { %1145 = vmatpush3.bf16.xpose.msk.msra.mxu1 %vm1283_vm1, %v1143_v5  ;;  %v1172_v5 = vpack.c.bf16 %v472_v2, %v471_v20 }
 0x130   :  { %1146 = vmatprep.subr.bf16.mxu1 %v1236_v14 }
 0x137   :  { %1149 = vmatpush3.bf16.xpose.msk.msra.mxu1 %vm1283_vm1, %v1147_v6  ;;  %v474_v6 = vmul.f32 %v1393_v30, %v1332_v13 }
 0x138   :  { %1150 = vmatprep.subr.bf16.mxu1 %v1236_v14 }
 0x139   :  { %v1175_v27 = vpack.c.bf16 %v474_v6, %v473_v21 }
 0x13f   :  { %1153 = vmatpush3.bf16.xpose.msk.msra.mxu1 %vm1283_vm1, %v1151_v8 }
 0x140   :  { %1154 = vmatprep.subr.bf16.mxu1 %v1236_v14 }
 0x147   :  { %1157 = vmatpush3.bf16.xpose.msk.msra.mxu1 %vm1283_vm1, %v1155_v9  ;;  %v476_v9 = vmul.f32 %v1411_v41, %v1332_v13 }
 0x148   :  { %1158 = vmatprep.subr.bf16.mxu1 %v1236_v14 }
 0x14f   :  { %1161 = vmatpush3.bf16.xpose.msk.msra.mxu1 %vm1283_vm1, %v1159_v10  ;;  %v1178_v10 = vpack.c.bf16 %v476_v9, %v475_v22 }
 0x156   :  { %1004 = vmatmul.mubr.msk.f32.vlgmr.msra.gmra.mrb[2].mxu1 %vm38_vm0, %v166_v16 }
 0x1f9   :  { %v296_v36 = vpop.f32.mrb[0].mxu1 }
 0x1fa   :  { %v924_v37 = vpop.f32.mrb[1].mxu1  ;;  %v301_v38 = vsel %vm300_vm3, %v296_v36, -inf }
 0x1fb   :  { %302 = vmax.xlane.f32.xlu0 %v301_v38 }
 0x229   :  { %v579_v49 = vpop.f32.mrb[2].mxu1 }
 0x22a   :  { %v1005_v50 = vpop.f32.mrb[3].mxu1  ;;  %v583_v51 = vsel %vm300_vm3, %v579_v49, -inf }
 0x22b   :  { %584 = vmax.xlane.f32.xlu0 %v583_v51 }
 0x288   :  { %v303_v52 = vpop.xlane.xlu0 %302 }
 0x289   :  { %v304_v53 = vsub.f32 %v296_v36, %v303_v52 }
 0x28b   :  { %v305_v7 = vmul.f32 1.442695, %v304_v53 }
 0x28d   :  { %1204 = vpow2.f32 %v305_v7 }
 0x297   :  { %v1205_v54 = vpop.eup %1204 }
 0x298   :  { %950 = vmatmul.mubr.msk.f32.vlgmr.msra.gmra.mrb[4].mxu0 %vm300_vm3, %v1205_v54 }
 0x299   :  { %1122 = vmatpush3.bf16.msra.mxu0 %v1121_v11  ;;  %976 = vmatprep.mubr.msk.f32.mxu0 %vm1237_vm2, %v1238_v15 }
 0x29a   :  { %1123 = vmatprep.subr.bf16.mxu0 %v1236_v14 }
 0x29d   :  { %1125 = vmatpush3.bf16.msra.mxu0 %v1124_v55 }
 0x29e   :  { %1126 = vmatprep.subr.bf16.mxu0 %v1236_v14 }
 0x2a1   :  { %1128 = vmatpush3.bf16.msra.mxu0 %v1127_v56 }
 0x2a2   :  { %1129 = vmatprep.subr.bf16.mxu0 %v1236_v14 }
 0x2a5   :  { %1131 = vmatpush3.bf16.msra.mxu0 %v1130_v57 }
 0x2a6   :  { %1132 = vmatprep.subr.bf16.mxu0 %v1236_v14 }
 0x2a9   :  { %1134 = vmatpush3.bf16.msra.mxu0 %v1133_v58 }
 0x2aa   :  { %1135 = vmatprep.subr.bf16.mxu0 %v1236_v14 }
 0x2ad   :  { %1137 = vmatpush3.bf16.msra.mxu0 %v1136_v59 }
 0x2ae   :  { %1162 = vmatprep.subr.bf16.mxu0 %v1236_v14 }
 0x2b0   :  { %977 = vmatmul.mubr.msk.f32.vlgmr.msra.gmra.mrb[6].mxu0 %vm300_vm3, %v1205_v54 }
 0x2b1   :  { %1164 = vmatpush3.bf16.msra.mxu0 %v1163_v62  ;;  %1030 = vmatprep.mubr.msk.f32.mxu0 %vm1237_vm2, %v1238_v15 }
 0x2b2   :  { %1165 = vmatprep.subr.bf16.mxu0 %v1236_v14 }
 0x2b5   :  { %1167 = vmatpush3.bf16.msra.mxu0 %v1166_v1 }
 0x2b6   :  { %1168 = vmatprep.subr.bf16.mxu0 %v1236_v14 }
 0x2b8   :  { %v585_v3 = vpop.xlane.xlu0 %584 }
 0x2b9   :  { %1170 = vmatpush3.bf16.msra.mxu0 %v1169_v25  ;;  %v586_v26 = vsub.f32 %v579_v49, %v585_v3 }
 0x2ba   :  { %1171 = vmatprep.subr.bf16.mxu0 %v1236_v14 }
 0x2bb   :  { %v587_v8 = vmul.f32 1.442695, %v586_v26 }
 0x2bd   :  { %1206 = vpow2.f32 %v587_v8  ;;  %1173 = vmatpush3.bf16.msra.mxu0 %v1172_v5 }
 0x2be   :  { %1174 = vmatprep.subr.bf16.mxu0 %v1236_v14 }
 0x2c1   :  { %1176 = vmatpush3.bf16.msra.mxu0 %v1175_v27 }
 0x2c2   :  { %1177 = vmatprep.subr.bf16.mxu0 %v1236_v14 }
 0x2c5   :  { %1179 = vmatpush3.bf16.msra.mxu0 %v1178_v10 }
 0x2c6   :  { %1180 = vmatprep.subr.bf16.mxu0 %v1236_v14 }
 0x2c7   :  { %v1207_v29 = vpop.eup %1206 }
 0x2c8   :  { %1031 = vmatmul.mubr.msk.f32.vlgmr.msra.gmra.mrb[8].mxu0 %vm300_vm3, %v1207_v29 }
 0x2c9   :  { %1182 = vmatpush3.bf16.msra.mxu0 %v1121_v11  ;;  %1057 = vmatprep.mubr.msk.f32.mxu0 %vm1237_vm2, %v1238_v15 }
 0x2ca   :  { %1183 = vmatprep.subr.bf16.mxu0 %v1236_v14 }
 0x2cd   :  { %1185 = vmatpush3.bf16.msra.mxu0 %v1124_v55 }
 0x2ce   :  { %1186 = vmatprep.subr.bf16.mxu0 %v1236_v14 }
 0x2d1   :  { %1188 = vmatpush3.bf16.msra.mxu0 %v1127_v56 }
 0x2d2   :  { %1189 = vmatprep.subr.bf16.mxu0 %v1236_v14 }
 0x2d5   :  { %1191 = vmatpush3.bf16.msra.mxu0 %v1130_v57 }
 0x2d6   :  { %1192 = vmatprep.subr.bf16.mxu0 %v1236_v14 }
 0x2d9   :  { %1194 = vmatpush3.bf16.msra.mxu0 %v1133_v58 }
 0x2da   :  { %1195 = vmatprep.subr.bf16.mxu0 %v1236_v14 }
 0x2dd   :  { %1197 = vmatpush3.bf16.msra.mxu0 %v1136_v59 }
 0x2e0   :  { %1058 = vmatmul.mubr.msk.f32.vlgmr.msra.gmra.mrb[10].mxu0 %vm300_vm3, %v1207_v29 }
 0x36b   :  { %v376_v12 = vpop.f32.mrb[4].mxu0 }
 0x36c   :  { %v951_v13 = vpop.f32.mrb[5].mxu0 }
 0x383   :  { %v446_v15 = vpop.f32.mrb[6].mxu0 }
 0x384   :  { %1208 = vrcp.f32 %v446_v15  ;;  %v978_v30 = vpop.f32.mrb[7].mxu0 }
 0x38e   :  { %v1209_v31 = vpop.eup %1208 }
 0x38f   :  { %v451_v41 = vmul.f32 %v1209_v31, %v376_v12 }
 0x391   :  { %452 = vst.msk [vmem:[#allocation2] sm:$0xff] %vm38_vm0, %v451_v41 }
 0x39b   :  { %v658_v16 = vpop.f32.mrb[8].mxu0 }
 0x39c   :  { %v1032_v19 = vpop.f32.mrb[9].mxu0 }
 0x3b3   :  { %v728_v23 = vpop.f32.mrb[10].mxu0 }
 0x3b4   :  { %1210 = vrcp.f32 %v728_v23  ;;  %v1059_v24 = vpop.f32.mrb[11].mxu0 }
 0x3be   :  { %v1211_v14 = vpop.eup %1210 }
 0x3bf   :  { %v733_v28 = vmul.f32 %v1211_v14, %v658_v16 }
 0x3c1   :  { %734 = vst.msk [vmem:[#allocation2 + $0x8] sm:$0xff] %vm38_vm0, %v733_v28 }
 0x3c2   :  { %1223 = shalt.err (!%p1220_p4)
}
 0x3c3   :  { %s1224_s14 = scalar_lea.hbm %s1585_s5, 256 }
 0x3c4   :  { %p1225_p5 = scmp.ne.s32.totalorder %s1585_s5, %s1224_s14  ;;  %p1228_p6 = scmp.lt.u32.totalorder %s1224_s14, %s1585_s5 }
 0x3c6   :  { %p1230_p7 = pnand %p1228_p6, %p1225_p5 }
 0x3c8   :  { %1233 = shalt.err (!%p1230_p7)
}
 0x3c9   :  { %s1240_s19 = smov 128   ;;  %s1241_s20 = smov 8  }
 0x3ca   :  { %746 = dma.vmem_to_hbm [thread:$0]  %s741_s11, 256, %s1585_s5, [#allocation3], %s1240_s19, %s1240_s19, %s1241_s20  }
 0x3cb   :  { %1234 = dma.done.wait [#allocation3], 256  }
 0x3cc   :  { %1235 = vsyncadd [#allocation3], 4294967040 }
 0x3cd   :  { %750 = vsyncpa [#allocation3], 1 }

</bundles_post_ra>
